<compile_context>
chip_gen: v6e
topology: v6e:2x2x1
jax: 0.10.0
libtpu: 0.0.40
codegen_flags: <defaults>
</compile_context>

<pallas_src>
import functools

import jax
import jax.numpy as jnp
from jax import lax
from jax.experimental import pallas as pl
from jax.experimental.pallas import tpu as pltpu


def _round_up(x: int, m: int) -> int:
    return ((x + m - 1) // m) * m


def _table_matmul_kernel(x_ref, w_ref, o_ref, acc_ref):
    """Computes one (tm, tn) output tile; K (reduction) is the innermost grid axis.

    x_ref: (tm, tk)   activation tile
    w_ref: (tn, tk)   weight tile in PyTorch nn.Linear layout (out, in)
    o_ref: (tm, tn)   output tile
    acc_ref: (tm, tn) f32 accumulator, resident across the K grid axis
    """

    @pl.when(pl.program_id(2) == 0)
    def _init():
        acc_ref[...] = jnp.zeros_like(acc_ref)

    # Contract the K axis of both operands (== x @ W.T) directly on the MXU; no
    # wrapper-side transpose / extra HBM copy of the weight.
    acc_ref[...] += lax.dot_general(
        x_ref[...],
        w_ref[...],
        dimension_numbers=(((1,), (1,)), ((), ())),
        preferred_element_type=jnp.float32,
    )

    @pl.when(pl.program_id(2) == pl.num_programs(2) - 1)
    def _finalize():
        o_ref[...] = acc_ref[...].astype(o_ref.dtype)


@functools.partial(jax.jit, static_argnames=("use_pallas",))
def table_forward(x: jax.Array, weight: jax.Array, use_pallas: bool = True) -> jax.Array:
    """Pallas equivalent of Table.forward.

    Args:
      x:      (batch, in_channels) float32
      weight: (out_channels, in_channels) float32  (PyTorch nn.Linear layout)
      use_pallas: set False to let XLA fuse the dot for tiny shapes where the
        pallas_call launch + DMA setup cost dominates the nanoseconds of MXU work.
    Returns:
      (batch, out_channels) float32
    """
    M, K = x.shape
    N, Kw = weight.shape
    assert K == Kw, "in_channels mismatch"

    if not use_pallas:
        return lax.dot_general(x, weight, (((1,), (1,)), ((), ())))

    # ---- tile selection (f32, portable across v5e / v6e / v7x VMEM budgets) ----
    tm = min(_round_up(M, 8), 512)     # sublane-aligned rows
    tn = min(_round_up(N, 128), 512)   # lane-dense output columns (unmasked vst)
    tk = min(_round_up(K, 128), 1024)  # deep K tiles amortize the store slot

    Mp, Np, Kp = _round_up(M, tm), _round_up(N, tn), _round_up(K, tk)

    # Zero padding is exact for a matmul; no-op when already aligned.
    xp = x if (Mp == M and Kp == K) else jnp.pad(x, ((0, Mp - M), (0, Kp - K)))
    wp = weight if (Np == N and Kp == K) else jnp.pad(weight, ((0, Np - N), (0, Kp - K)))

    grid = (Mp // tm, Np // tn, Kp // tk)

    # Double-buffered inputs + double-buffered output + f32 accumulator, with 2x
    # headroom; clamped so it always fits v7x's 64 MiB physical VMEM per core.
    tile_bytes = 4 * (2 * tm * tk + 2 * tn * tk + 3 * tm * tn)
    vmem_limit = int(min(max(2 * tile_bytes, 32 * 1024 * 1024), 56 * 1024 * 1024))

    out_padded = pl.pallas_call(
        _table_matmul_kernel,
        out_shape=jax.ShapeDtypeStruct((Mp, Np), x.dtype),
        grid_spec=pltpu.PrefetchScalarGridSpec(
            num_scalar_prefetch=0,
            grid=grid,
            in_specs=[
                pl.BlockSpec((tm, tk), lambda i, j, k: (i, k)),
                pl.BlockSpec((tn, tk), lambda i, j, k: (j, k)),
            ],
            out_specs=pl.BlockSpec((tm, tn), lambda i, j, k: (i, j)),
            scratch_shapes=[pltpu.VMEM((tm, tn), jnp.float32)],
        ),
        compiler_params=pltpu.CompilerParams(
            dimension_semantics=("parallel", "parallel", "arbitrary"),
            vmem_limit_bytes=vmem_limit,
        ),
        cost_estimate=pl.CostEstimate(
            flops=2 * Mp * Np * Kp,
            transcendentals=0,
            bytes_accessed=4 * (Mp * Kp + Np * Kp + Mp * Np),
        ),
    )(xp, wp)

    return out_padded[:M, :N]


if __name__ == "__main__":
    key = jax.random.PRNGKey(0)
    k_x, k_w, k_x2, k_w2 = jax.random.split(key, 4)

    # --- Module's native (tiny) shape: Table(in_channels=4, out_channels=2) ------
    in_channels, out_channels, batch = 4, 2, 2
    x = jax.random.uniform(k_x, (batch, in_channels), dtype=jnp.float32)

    # Exact PyTorch init: uniform_(0, 0) == all zeros, shape (out, in).
    w_init = jnp.zeros((out_channels, in_channels), dtype=jnp.float32)
    out_init = jax.block_until_ready(table_forward(x, w_init))
    assert out_init.shape == (batch, out_channels)
    assert jnp.allclose(out_init, jnp.zeros_like(out_init)), "zero-init mismatch"

    # Non-vacuous check: random non-zero weight (post-training Table state).
    w_rand = jax.random.normal(k_w, (out_channels, in_channels), dtype=jnp.float32)
    out_rand = jax.block_until_ready(table_forward(x, w_rand))
    ref_rand = jnp.dot(x, w_rand.T, precision=lax.Precision.HIGHEST)
    assert jnp.allclose(out_rand, ref_rand, rtol=1e-2, atol=1e-2), "small-shape mismatch"

    # Larger shape: exercises a multi-step (M, N, K) grid, padding, accumulator.
    M2, K2, N2 = 640, 2304, 384
    x2 = jax.random.uniform(k_x2, (M2, K2), dtype=jnp.float32)
    w2 = jax.random.normal(k_w2, (N2, K2), dtype=jnp.float32) / jnp.sqrt(
        jnp.asarray(K2, jnp.float32)
    )
    out2 = jax.block_until_ready(table_forward(x2, w2))
    ref2 = jnp.dot(x2, w2.T, precision=lax.Precision.HIGHEST)
    assert out2.shape == (M2, N2)
    assert jnp.allclose(out2, ref2, rtol=1e-2, atol=1e-2), "large-shape mismatch"

    print("KERNEL_OK")
</pallas_src>

<mosaic_0001>
module attributes {stable_mosaic.version = 11 : i64} {
  func.func @_table_matmul_kernel(%arg0: i32, %arg1: i32, %arg2: i32, %arg3: memref<8x128xf32, #tpu.memory_space<vmem>>, %arg4: memref<128x128xf32, #tpu.memory_space<vmem>>, %arg5: memref<8x128xf32, #tpu.memory_space<vmem>>, %arg6: memref<8x128xf32, #tpu.memory_space<vmem>>) attributes {dimension_semantics = [#tpu.dimension_semantics<parallel>, #tpu.dimension_semantics<parallel>, #tpu.dimension_semantics<arbitrary>], iteration_bounds = array<i64: 1, 1, 1>, scalar_prefetch = 0 : i64, scratch_operands = 1 : i64, tpu.core_type = #tpu.core_type<tc>, window_params = [{transform_indices = @transform_0, window_bounds = array<i64: 8, 128>}, {transform_indices = @transform_1, window_bounds = array<i64: 128, 128>}, {transform_indices = @transform_2, window_bounds = array<i64: 8, 128>}]} {
    %c0_i32 = arith.constant 0 : i32
    %0 = arith.cmpi eq, %arg2, %c0_i32 : i32
    %1 = arith.extui %0 : i1 to i32
    %c0_i32_0 = arith.constant 0 : i32
    %2 = arith.cmpi ne, %1, %c0_i32_0 : i32
    scf.if %2 {
      %cst_10 = arith.constant 0.000000e+00 : f32
      %12 = vector.broadcast %cst_10 : f32 to vector<8x128xf32>
      %c0_11 = arith.constant 0 : index
      %c0_12 = arith.constant 0 : index
      %13 = vector.load %arg6[%c0_11, %c0_12] : memref<8x128xf32, #tpu.memory_space<vmem>>, vector<8x128xf32>
      tpu.vector_store %arg6[%c0_11, %c0_12], %12 {strides = array<i32>} : memref<8x128xf32, #tpu.memory_space<vmem>>, vector<8x128xf32>,
    } else {
    }
    %c0 = arith.constant 0 : index
    %c0_1 = arith.constant 0 : index
    %3 = vector.load %arg6[%c0, %c0_1] : memref<8x128xf32, #tpu.memory_space<vmem>>, vector<8x128xf32>
    %c0_2 = arith.constant 0 : index
    %c0_3 = arith.constant 0 : index
    %4 = vector.load %arg3[%c0_2, %c0_3] : memref<8x128xf32, #tpu.memory_space<vmem>>, vector<8x128xf32>
    %c0_4 = arith.constant 0 : index
    %c0_5 = arith.constant 0 : index
    %5 = vector.load %arg4[%c0_4, %c0_5] : memref<128x128xf32, #tpu.memory_space<vmem>>, vector<128x128xf32>
    %cst = arith.constant dense<0.000000e+00> : vector<8x128xf32>
    %6 = tpu.matmul %4, %5, %cst {dimension_numbers = #tpu.dot_dimension_numbers<[1], [1], [0], [0], [0, 0, 1, 0], [], []>} : vector<8x128xf32>, vector<128x128xf32>, vector<8x128xf32> -> vector<8x128xf32>
    %7 = arith.addf %3, %6 : vector<8x128xf32>
    %c0_6 = arith.constant 0 : index
    %c0_7 = arith.constant 0 : index
    %8 = vector.load %arg6[%c0_6, %c0_7] : memref<8x128xf32, #tpu.memory_space<vmem>>, vector<8x128xf32>
    tpu.vector_store %arg6[%c0_6, %c0_7], %7 {strides = array<i32>} : memref<8x128xf32, #tpu.memory_space<vmem>>, vector<8x128xf32>,
    %c0_i32_8 = arith.constant 0 : i32
    %9 = arith.cmpi eq, %arg2, %c0_i32_8 : i32
    %10 = arith.extui %9 : i1 to i32
    %c0_i32_9 = arith.constant 0 : i32
    %11 = arith.cmpi ne, %10, %c0_i32_9 : i32
    scf.if %11 {
      %c0_10 = arith.constant 0 : index
      %c0_11 = arith.constant 0 : index
      %12 = vector.load %arg6[%c0_10, %c0_11] : memref<8x128xf32, #tpu.memory_space<vmem>>, vector<8x128xf32>
      %c0_12 = arith.constant 0 : index
      %c0_13 = arith.constant 0 : index
      %13 = vector.load %arg5[%c0_12, %c0_13] : memref<8x128xf32, #tpu.memory_space<vmem>>, vector<8x128xf32>
      tpu.vector_store %arg5[%c0_12, %c0_13], %12 {strides = array<i32>} : memref<8x128xf32, #tpu.memory_space<vmem>>, vector<8x128xf32>,
    } else {
    }
    return
  }
  func.func @transform_0(%arg0: i32, %arg1: i32, %arg2: i32) -> (i32, i32) {
    %c0_i32 = arith.constant 0 : i32
    return %arg0, %arg2 : i32, i32
  }
  func.func @transform_1(%arg0: i32, %arg1: i32, %arg2: i32) -> (i32, i32) {
    %c0_i32 = arith.constant 0 : i32
    return %arg1, %arg2 : i32, i32
  }
  func.func @transform_2(%arg0: i32, %arg1: i32, %arg2: i32) -> (i32, i32) {
    %c0_i32 = arith.constant 0 : i32
    return %arg0, %arg1 : i32, i32
  }
}

</mosaic_0001>

<bundles_post_ra>
// kernel: table_forward.1
= control target key start
LH: loop header
LB: loop body
LE: loop exit
PB: predicated region body
PF: predicated region fallthrough
CT: control target
= control target key end

     0   :  { %v169_v0 = vmov 0.0   ;;  %vm170_vm0 = vmmov 0   ;;  %s240_s1 = inlined_call_operand.vmem [shape: f32[128,128], index: 1, kind: input, shape index: {}]   ;;  %s241_s0 = inlined_call_operand.vmem [shape: f32[8,128], index: 0, kind: input, shape index: {}]   ;;  %s242_s2 = inlined_call_operand.vmem [shape: f32[8,128], index: 2, kind: output, shape index: {}]  }
   0x1   :  { %132 = vmatprep.subr.mxu0 %v169_v0  ;;  %v33_v1 = vld [vmem:[%s240_s1 + $0x78] sm:$0xff]  ;;  %164 = vmatprep.mubr.msk.f32.mxu0 %vm170_vm0, %v169_v0  ;;  %v32_v2 = vld [vmem:[%s240_s1 + $0x70] sm:$0xff]  ;;  %v31_v3 = vld [vmem:[%s240_s1 + $0x68] sm:$0xff] }
   0x2   :  { %133 = vmatpush3.xpose.msra.mxu0 %v33_v1  ;;  %v30_v4 = vld [vmem:[%s240_s1 + $0x60] sm:$0xff]  ;;  %v29_v5 = vld [vmem:[%s240_s1 + $0x58] sm:$0xff]  ;;  %v28_v6 = vld [vmem:[%s240_s1 + $0x50] sm:$0xff] }
   0x3   :  { %134 = vmatprep.subr.mxu0 %v169_v0  ;;  %v27_v7 = vld [vmem:[%s240_s1 + $0x48] sm:$0xff]  ;;  %v26_v8 = vld [vmem:[%s240_s1 + $0x40] sm:$0xff]  ;;  %v25_v9 = vld [vmem:[%s240_s1 + $0x38] sm:$0xff] }
   0x4   :  { %v24_v10 = vld [vmem:[%s240_s1 + $0x30] sm:$0xff]  ;;  %v23_v11 = vld [vmem:[%s240_s1 + $0x28] sm:$0xff]  ;;  %v22_v12 = vld [vmem:[%s240_s1 + $0x20] sm:$0xff] }
   0x5   :  { %v21_v13 = vld [vmem:[%s240_s1 + $0x18] sm:$0xff]  ;;  %v20_v14 = vld [vmem:[%s240_s1 + $0x10] sm:$0xff]  ;;  %v19_v15 = vld [vmem:[%s240_s1 + $0x8] sm:$0xff] }
   0x6   :  { %135 = vmatpush3.xpose.msra.mxu0 %v32_v2  ;;  %v18_v16 = vld [vmem:[%s240_s1] sm:$0xff] }
   0x7   :  { %136 = vmatprep.subr.mxu0 %v169_v0  ;;  %v17_v17 = vld [vmem:[%s241_s0] sm:$0xff] }
   0xa   :  { %137 = vmatpush3.xpose.msra.mxu0 %v31_v3 }
   0xb   :  { %138 = vmatprep.subr.mxu0 %v169_v0 }
   0xe   :  { %139 = vmatpush3.xpose.msra.mxu0 %v30_v4 }
   0xf   :  { %140 = vmatprep.subr.mxu0 %v169_v0 }
  0x12   :  { %141 = vmatpush3.xpose.msra.mxu0 %v29_v5 }
  0x13   :  { %142 = vmatprep.subr.mxu0 %v169_v0 }
  0x16   :  { %143 = vmatpush3.xpose.msra.mxu0 %v28_v6 }
  0x17   :  { %144 = vmatprep.subr.mxu0 %v169_v0 }
  0x1a   :  { %145 = vmatpush3.xpose.msra.mxu0 %v27_v7 }
  0x1b   :  { %146 = vmatprep.subr.mxu0 %v169_v0 }
  0x1e   :  { %147 = vmatpush3.xpose.msra.mxu0 %v26_v8 }
  0x1f   :  { %148 = vmatprep.subr.mxu0 %v169_v0 }
  0x22   :  { %149 = vmatpush3.xpose.msra.mxu0 %v25_v9 }
  0x23   :  { %150 = vmatprep.subr.mxu0 %v169_v0 }
  0x26   :  { %151 = vmatpush3.xpose.msra.mxu0 %v24_v10 }
  0x27   :  { %152 = vmatprep.subr.mxu0 %v169_v0 }
  0x2a   :  { %153 = vmatpush3.xpose.msra.mxu0 %v23_v11 }
  0x2b   :  { %154 = vmatprep.subr.mxu0 %v169_v0 }
  0x2e   :  { %155 = vmatpush3.xpose.msra.mxu0 %v22_v12 }
  0x2f   :  { %156 = vmatprep.subr.mxu0 %v169_v0 }
  0x32   :  { %157 = vmatpush3.xpose.msra.mxu0 %v21_v13 }
  0x33   :  { %158 = vmatprep.subr.mxu0 %v169_v0 }
  0x36   :  { %159 = vmatpush3.xpose.msra.mxu0 %v20_v14 }
  0x37   :  { %160 = vmatprep.subr.mxu0 %v169_v0 }
  0x3a   :  { %161 = vmatpush3.xpose.msra.mxu0 %v19_v15 }
  0x3b   :  { %162 = vmatprep.subr.mxu0 %v169_v0 }
  0x3e   :  { %163 = vmatpush3.xpose.msra.mxu0 %v18_v16 }
  0x41   :  { %165 = vmatmul.mubr.f32.vlgmr.msra.gmra.mxu0 %v17_v17 }
 0x101   :  { %v100_v18 = vpop.f32.mrf.mxu0 }
 0x102   :  { %110 = vst [vmem:[%s242_s2] sm:$0xff] %v100_v18 }
 0x103   :  { %v166_v19 = vpop.f32.mrf.mxu0 }

</bundles_post_ra>
